<compile_context>
chip_gen: v7x
topology: tpu7x:2x2x1
jax: 0.10.0
libtpu: 0.0.40
codegen_flags: <defaults>
</compile_context>

<pallas_src>
import jax
import jax.numpy as jnp
from jax.experimental import pallas as pl
from jax.experimental.pallas import tpu as pltpu


def _round_up(x, m):
    return (x + m - 1) // m * m


def _qfunc_kernel(obs_ref, act_ref, w1ot_ref, w1at_ref, b1t_ref, w2t_ref,
                  b2t_ref, w3_ref, b3_ref, o_ref):
    """One batch tile of the Q-function MLP for NH fused heads.

    obs_ref : (TB, obs_dim)        act_ref : (TB, act_dim)
    w1ot    : (NH, H, obs_dim)     w1at    : (NH, H, act_dim)   b1t : (NH, H, 1)
    w2t     : (NH, H, H)           b2t     : (NH, H, 1)
    w3      : (NH, H, 1)           b3      : SMEM (NH,)
    o_ref   : (1, NH, TB)  lane-dense Q rows for this batch tile.

    Intermediates use the transposed (H, TB) layout so the batch sits on the
    128-lane axis: bias/ReLU run on dense vregs and the final layer is a VPU
    multiply + sublane reduce producing the output row directly.
    """
    obs = obs_ref[...]
    act = act_ref[...]
    n_heads = o_ref.shape[1]
    # Contract the last dims of both operands (A(m,k) . B(n,k)^T), the same
    # pattern as q.k^T in flash attention -> no explicit transpose of the
    # activation tile is needed.
    trans_b = (((1,), (1,)), ((), ()))

    rows = []
    for h in range(n_heads):  # static unroll; NH is 1 or 2
        h1 = (
            jax.lax.dot_general(w1ot_ref[h], obs, trans_b,
                                preferred_element_type=jnp.float32)
            + jax.lax.dot_general(w1at_ref[h], act, trans_b,
                                  preferred_element_type=jnp.float32)
            + b1t_ref[h]
        )                                                     # (H, TB)
        h1 = jnp.maximum(h1, 0.0)
        h2 = jnp.dot(w2t_ref[h], h1,
                     preferred_element_type=jnp.float32) + b2t_ref[h]
        h2 = jnp.maximum(h2, 0.0)                             # (H, TB)
        # Final layer: (H,1) * (H,TB) -> sublane reduce -> (1, TB).
        q = jnp.sum(w3_ref[h] * h2, axis=0, keepdims=True) + b3_ref[h]
        rows.append(q)                                        # (1, TB)

    o_ref[...] = jnp.concatenate(rows, axis=0)[None].astype(o_ref.dtype)


def _prep_head(params, obs_dim, act_dim):
    """Split / transpose one head's weights for the (H, TB) kernel layout."""
    w1, b1, w2, b2, w3, b3 = params
    in_dim, H = w1.shape
    assert in_dim == obs_dim + act_dim
    return (
        w1[:obs_dim].T,                       # (H, obs_dim)
        w1[obs_dim:].T,                       # (H, act_dim)
        b1.reshape(H, 1),                     # (H, 1)
        w2.T,                                 # (H, H)
        b2.reshape(H, 1),                     # (H, 1)
        w3.reshape(H, 1),                     # (H, 1)
        jnp.asarray(b3, jnp.float32).reshape(()),
    )


def _q_forward(obs, action, params_list, *, tile_b=None):
    """Shared wrapper: runs NH fused Q heads, returns (B, NH) float32."""
    assert obs.shape[0] == action.shape[0]
    B, obs_dim = obs.shape
    act_dim = action.shape[1]
    n_heads = len(params_list)

    heads = [_prep_head(p, obs_dim, act_dim) for p in params_list]
    H = heads[0][0].shape[0]

    w1ot = jnp.stack([h[0] for h in heads])   # (NH, H, obs_dim)
    w1at = jnp.stack([h[1] for h in heads])   # (NH, H, act_dim)
    b1t = jnp.stack([h[2] for h in heads])    # (NH, H, 1)
    w2t = jnp.stack([h[3] for h in heads])    # (NH, H, H)
    b2t = jnp.stack([h[4] for h in heads])    # (NH, H, 1)
    w3c = jnp.stack([h[5] for h in heads])    # (NH, H, 1)
    b3v = jnp.stack([h[6] for h in heads])    # (NH,)

    # Batch tile: target 2048 rows/step so the ~0.35 us per-grid-step overhead
    # is amortised, capped to ceil(B/2) (rounded to 128) so num_tiles >= 2 when
    # B allows it -> v7x can shard the "parallel" axis over both TensorCores.
    if tile_b is None:
        tile_b = min(2048, _round_up(pl.cdiv(B, 2), 128))
    tile_b = max(128, _round_up(int(tile_b), 128))
    b_pad = _round_up(B, tile_b)
    if b_pad != B:
        obs = jnp.pad(obs, ((0, b_pad - B), (0, 0)))
        action = jnp.pad(action, ((0, b_pad - B), (0, 0)))
    num_tiles = b_pad // tile_b

    act_itemsize = jnp.dtype(obs.dtype).itemsize
    w_bytes = sum(int(jnp.dtype(a.dtype).itemsize) * int(a.size)
                  for a in (w1ot, w1at, b1t, w2t, b2t, w3c, b3v))
    cost = pl.CostEstimate(
        flops=2 * b_pad * n_heads * (obs_dim * H + act_dim * H + H * H + H),
        transcendentals=0,
        bytes_accessed=(b_pad * (obs_dim + act_dim) * act_itemsize
                        + b_pad * n_heads * 4 + w_bytes),
    )

    out = pl.pallas_call(
        _qfunc_kernel,
        out_shape=jax.ShapeDtypeStruct((num_tiles, n_heads, tile_b),
                                       jnp.float32),
        grid_spec=pltpu.PrefetchScalarGridSpec(
            num_scalar_prefetch=0,
            grid=(num_tiles,),
            in_specs=[
                pl.BlockSpec((tile_b, obs_dim), lambda i: (i, 0)),   # obs tile
                pl.BlockSpec((tile_b, act_dim), lambda i: (i, 0)),   # act tile
                # Constant index_map -> fetched once, VMEM-resident across the
                # whole grid (no per-step weight re-DMA).
                pl.BlockSpec((n_heads, H, obs_dim), lambda i: (0, 0, 0)),
                pl.BlockSpec((n_heads, H, act_dim), lambda i: (0, 0, 0)),
                pl.BlockSpec((n_heads, H, 1), lambda i: (0, 0, 0)),
                pl.BlockSpec((n_heads, H, H), lambda i: (0, 0, 0)),
                pl.BlockSpec((n_heads, H, 1), lambda i: (0, 0, 0)),
                pl.BlockSpec((n_heads, H, 1), lambda i: (0, 0, 0)),
                pl.BlockSpec(memory_space=pltpu.MemorySpace.SMEM),   # b3
            ],
            out_specs=pl.BlockSpec((1, n_heads, tile_b),
                                   lambda i: (i, 0, 0)),
        ),
        compiler_params=pltpu.CompilerParams(
            dimension_semantics=("parallel",),
            vmem_limit_bytes=32 * 1024 * 1024,
        ),
        cost_estimate=cost,
    )(obs, action, w1ot, w1at, b1t, w2t, b2t, w3c, b3v)

    # (num_tiles, NH, tile_b) -> (B, NH); padded rows are sliced off.
    return out.transpose(1, 0, 2).reshape(n_heads, b_pad)[:, :B].T


def q_function(obs, action, params, *, tile_b=None):
    """Pallas implementation of QFunction.forward(obs, action) -> (B, 1)."""
    return _q_forward(obs, action, (params,), tile_b=tile_b)


def q_function_twin(obs, action, params_a, params_b, *, tile_b=None):
    """Fused SAC twin-Q: both critics share obs/act DMA and grid steps."""
    q = _q_forward(obs, action, (params_a, params_b), tile_b=tile_b)
    return q[:, 0:1], q[:, 1:2]


def init_params(key, obs_dim, action_dim, hidden_dim):
    """Deterministic init matching nn.Linear shapes (stored transposed)."""
    in_dim = obs_dim + action_dim
    k1, k2, k3, k4, k5, k6 = jax.random.split(key, 6)

    def lin(kw, kb, fan_in, fan_out):
        bound = 1.0 / jnp.sqrt(fan_in)
        w = jax.random.uniform(kw, (fan_in, fan_out), jnp.float32, -bound, bound)
        b = jax.random.uniform(kb, (1, fan_out), jnp.float32, -bound, bound)
        return w, b

    w1, b1 = lin(k1, k2, in_dim, hidden_dim)
    w2, b2 = lin(k3, k4, hidden_dim, hidden_dim)
    w3, b3 = lin(k5, k6, hidden_dim, 1)
    return (w1, b1, w2, b2, w3, b3.reshape(1))


def q_function_ref(obs, action, params):
    """Pure-JAX reference for correctness check."""
    w1, b1, w2, b2, w3, b3 = params
    x = jnp.concatenate([obs, action], axis=1)
    h1 = jnp.maximum(x @ w1 + b1, 0.0)
    h2 = jnp.maximum(h1 @ w2 + b2, 0.0)
    return h2 @ w3 + b3


if __name__ == "__main__":
    # Small shapes consistent with the module's forward.
    batch = 8
    obs_dim = 24
    action_dim = 8
    hidden_dim = 32

    key = jax.random.PRNGKey(0)
    k_obs, k_act, k_p1, k_p2 = jax.random.split(key, 4)
    obs = jax.random.normal(k_obs, (batch, obs_dim), jnp.float32)
    action = jax.random.normal(k_act, (batch, action_dim), jnp.float32)
    params = init_params(k_p1, obs_dim, action_dim, hidden_dim)

    q = jax.block_until_ready(q_function(obs, action, params))
    q_ref = q_function_ref(obs, action, params)
    assert q.shape == (batch, 1)
    assert jnp.allclose(q, q_ref, atol=1e-4, rtol=1e-4)

    # Fused twin-Q head (second SAC critic shares activation DMA / grid).
    params2 = init_params(k_p2, obs_dim, action_dim, hidden_dim)
    q1, q2 = jax.block_until_ready(q_function_twin(obs, action, params, params2))
    assert jnp.allclose(q1, q_ref, atol=1e-4, rtol=1e-4)
    assert jnp.allclose(q2, q_function_ref(obs, action, params2),
                        atol=1e-4, rtol=1e-4)

    print("KERNEL_OK")
</pallas_src>

<mosaic_0001>
module attributes {stable_mosaic.version = 11 : i64} {
  func.func @_qfunc_kernel(%arg0: i32, %arg1: memref<128x24xf32, #tpu.memory_space<vmem>>, %arg2: memref<128x8xf32, #tpu.memory_space<vmem>>, %arg3: memref<1x32x24xf32, #tpu.memory_space<vmem>>, %arg4: memref<1x32x8xf32, #tpu.memory_space<vmem>>, %arg5: memref<1x32x1xf32, #tpu.memory_space<vmem>>, %arg6: memref<1x32x32xf32, #tpu.memory_space<vmem>>, %arg7: memref<1x32x1xf32, #tpu.memory_space<vmem>>, %arg8: memref<1x32x1xf32, #tpu.memory_space<vmem>>, %arg9: memref<1xf32, #tpu.memory_space<smem>>, %arg10: memref<1x1x128xf32, #tpu.memory_space<vmem>>) attributes {dimension_semantics = [#tpu.dimension_semantics<parallel>], iteration_bounds = array<i64: 1>, scalar_prefetch = 0 : i64, scratch_operands = 0 : i64, tpu.core_type = #tpu.core_type<tc>, window_params = [{transform_indices = @transform_0, window_bounds = array<i64: 128, 24>}, {transform_indices = @transform_1, window_bounds = array<i64: 128, 8>}, {pipeline_mode = #tpu.pipeline_mode<synchronous>, transform_indices = @transform_2, window_bounds = array<i64: 1, 32, 24>}, {pipeline_mode = #tpu.pipeline_mode<synchronous>, transform_indices = @transform_3, window_bounds = array<i64: 1, 32, 8>}, {pipeline_mode = #tpu.pipeline_mode<synchronous>, transform_indices = @transform_4, window_bounds = array<i64: 1, 32, 1>}, {pipeline_mode = #tpu.pipeline_mode<synchronous>, transform_indices = @transform_5, window_bounds = array<i64: 1, 32, 32>}, {pipeline_mode = #tpu.pipeline_mode<synchronous>, transform_indices = @transform_6, window_bounds = array<i64: 1, 32, 1>}, {pipeline_mode = #tpu.pipeline_mode<synchronous>, transform_indices = @transform_7, window_bounds = array<i64: 1, 32, 1>}, {transform_indices = @transform_8, window_bounds = array<i64: 1>}, {transform_indices = @transform_9, window_bounds = array<i64: 1, 1, 128>}]} {
    %c0 = arith.constant 0 : index
    %c0_0 = arith.constant 0 : index
    %0 = vector.load %arg1[%c0, %c0_0] : memref<128x24xf32, #tpu.memory_space<vmem>>, vector<128x24xf32>
    %c0_1 = arith.constant 0 : index
    %c0_2 = arith.constant 0 : index
    %1 = vector.load %arg2[%c0_1, %c0_2] : memref<128x8xf32, #tpu.memory_space<vmem>>, vector<128x8xf32>
    %c0_3 = arith.constant 0 : index
    %c0_4 = arith.constant 0 : index
    %c0_5 = arith.constant 0 : index
    %2 = vector.load %arg3[%c0_3, %c0_4, %c0_5] : memref<1x32x24xf32, #tpu.memory_space<vmem>>, vector<1x32x24xf32>
    %3 = vector.shape_cast %2 : vector<1x32x24xf32> to vector<32x24xf32>
    %cst = arith.constant dense<0.000000e+00> : vector<32x128xf32>
    %4 = tpu.matmul %3, %0, %cst {dimension_numbers = #tpu.dot_dimension_numbers<[1], [1], [0], [0], [0, 0, 1, 0], [], []>} : vector<32x24xf32>, vector<128x24xf32>, vector<32x128xf32> -> vector<32x128xf32>
    %c0_6 = arith.constant 0 : index
    %c0_7 = arith.constant 0 : index
    %c0_8 = arith.constant 0 : index
    %5 = vector.load %arg4[%c0_6, %c0_7, %c0_8] : memref<1x32x8xf32, #tpu.memory_space<vmem>>, vector<1x32x8xf32>
    %6 = vector.shape_cast %5 : vector<1x32x8xf32> to vector<32x8xf32>
    %cst_9 = arith.constant dense<0.000000e+00> : vector<32x128xf32>
    %7 = tpu.matmul %6, %1, %cst_9 {dimension_numbers = #tpu.dot_dimension_numbers<[1], [1], [0], [0], [0, 0, 1, 0], [], []>} : vector<32x8xf32>, vector<128x8xf32>, vector<32x128xf32> -> vector<32x128xf32>
    %8 = arith.addf %4, %7 : vector<32x128xf32>
    %c0_10 = arith.constant 0 : index
    %c0_11 = arith.constant 0 : index
    %c0_12 = arith.constant 0 : index
    %9 = vector.load %arg5[%c0_10, %c0_11, %c0_12] : memref<1x32x1xf32, #tpu.memory_space<vmem>>, vector<1x32x1xf32>
    %10 = vector.shape_cast %9 : vector<1x32x1xf32> to vector<32x1xf32>
    %11 = vector.broadcast %10 : vector<32x1xf32> to vector<32x128xf32>
    %12 = arith.addf %8, %11 : vector<32x128xf32>
    %cst_13 = arith.constant 0.000000e+00 : f32
    %13 = vector.broadcast %cst_13 : f32 to vector<32x128xf32>
    %14 = arith.maximumf %12, %13 : vector<32x128xf32>
    %c0_14 = arith.constant 0 : index
    %c0_15 = arith.constant 0 : index
    %c0_16 = arith.constant 0 : index
    %15 = vector.load %arg6[%c0_14, %c0_15, %c0_16] : memref<1x32x32xf32, #tpu.memory_space<vmem>>, vector<1x32x32xf32>
    %16 = vector.shape_cast %15 : vector<1x32x32xf32> to vector<32x32xf32>
    %cst_17 = arith.constant dense<0.000000e+00> : vector<32x128xf32>
    %17 = tpu.matmul %16, %14, %cst_17 {dimension_numbers = #tpu.dot_dimension_numbers<[1], [0], [0], [1], [0, 0, 1, 1], [], []>} : vector<32x32xf32>, vector<32x128xf32>, vector<32x128xf32> -> vector<32x128xf32>
    %c0_18 = arith.constant 0 : index
    %c0_19 = arith.constant 0 : index
    %c0_20 = arith.constant 0 : index
    %18 = vector.load %arg7[%c0_18, %c0_19, %c0_20] : memref<1x32x1xf32, #tpu.memory_space<vmem>>, vector<1x32x1xf32>
    %19 = vector.shape_cast %18 : vector<1x32x1xf32> to vector<32x1xf32>
    %20 = vector.broadcast %19 : vector<32x1xf32> to vector<32x128xf32>
    %21 = arith.addf %17, %20 : vector<32x128xf32>
    %cst_21 = arith.constant 0.000000e+00 : f32
    %22 = vector.broadcast %cst_21 : f32 to vector<32x128xf32>
    %23 = arith.maximumf %21, %22 : vector<32x128xf32>
    %c0_22 = arith.constant 0 : index
    %c0_23 = arith.constant 0 : index
    %c0_24 = arith.constant 0 : index
    %24 = vector.load %arg8[%c0_22, %c0_23, %c0_24] : memref<1x32x1xf32, #tpu.memory_space<vmem>>, vector<1x32x1xf32>
    %25 = vector.shape_cast %24 : vector<1x32x1xf32> to vector<32x1xf32>
    %26 = vector.broadcast %25 : vector<32x1xf32> to vector<32x128xf32>
    %27 = arith.mulf %26, %23 : vector<32x128xf32>
    %cst_25 = arith.constant dense<0.000000e+00> : vector<128xf32>
    %28 = vector.multi_reduction <add>, %27, %cst_25 [0] : vector<32x128xf32> to vector<128xf32>
    %29 = vector.shape_cast %28 : vector<128xf32> to vector<1x128xf32>
    %c0_26 = arith.constant 0 : index
    %30 = memref.load %arg9[%c0_26] : memref<1xf32, #tpu.memory_space<smem>>
    %31 = vector.broadcast %30 : f32 to vector<1x128xf32>
    %32 = arith.addf %29, %31 : vector<1x128xf32>
    %33 = vector.shape_cast %32 : vector<1x128xf32> to vector<1x1x128xf32>
    %c0_27 = arith.constant 0 : index
    %c0_28 = arith.constant 0 : index
    %c0_29 = arith.constant 0 : index
    %34 = vector.load %arg10[%c0_27, %c0_28, %c0_29] : memref<1x1x128xf32, #tpu.memory_space<vmem>>, vector<1x1x128xf32>
    tpu.vector_store %arg10[%c0_27, %c0_28, %c0_29], %33 {strides = array<i32>} : memref<1x1x128xf32, #tpu.memory_space<vmem>>, vector<1x1x128xf32>,
    return
  }
  func.func @transform_0(%arg0: i32) -> (i32, i32) {
    %c0_i32 = arith.constant 0 : i32
    %c0_i32_0 = arith.constant 0 : i32
    return %arg0, %c0_i32 : i32, i32
  }
  func.func @transform_1(%arg0: i32) -> (i32, i32) {
    %c0_i32 = arith.constant 0 : i32
    %c0_i32_0 = arith.constant 0 : i32
    return %arg0, %c0_i32 : i32, i32
  }
  func.func @transform_2(%arg0: i32) -> (i32, i32, i32) {
    %c0_i32 = arith.constant 0 : i32
    %c0_i32_0 = arith.constant 0 : i32
    %c0_i32_1 = arith.constant 0 : i32
    %c0_i32_2 = arith.constant 0 : i32
    return %c0_i32, %c0_i32_0, %c0_i32_1 : i32, i32, i32
  }
  func.func @transform_3(%arg0: i32) -> (i32, i32, i32) {
    %c0_i32 = arith.constant 0 : i32
    %c0_i32_0 = arith.constant 0 : i32
    %c0_i32_1 = arith.constant 0 : i32
    %c0_i32_2 = arith.constant 0 : i32
    return %c0_i32, %c0_i32_0, %c0_i32_1 : i32, i32, i32
  }
  func.func @transform_4(%arg0: i32) -> (i32, i32, i32) {
    %c0_i32 = arith.constant 0 : i32
    %c0_i32_0 = arith.constant 0 : i32
    %c0_i32_1 = arith.constant 0 : i32
    %c0_i32_2 = arith.constant 0 : i32
    return %c0_i32, %c0_i32_0, %c0_i32_1 : i32, i32, i32
  }
  func.func @transform_5(%arg0: i32) -> (i32, i32, i32) {
    %c0_i32 = arith.constant 0 : i32
    %c0_i32_0 = arith.constant 0 : i32
    %c0_i32_1 = arith.constant 0 : i32
    %c0_i32_2 = arith.constant 0 : i32
    return %c0_i32, %c0_i32_0, %c0_i32_1 : i32, i32, i32
  }
  func.func @transform_6(%arg0: i32) -> (i32, i32, i32) {
    %c0_i32 = arith.constant 0 : i32
    %c0_i32_0 = arith.constant 0 : i32
    %c0_i32_1 = arith.constant 0 : i32
    %c0_i32_2 = arith.constant 0 : i32
    return %c0_i32, %c0_i32_0, %c0_i32_1 : i32, i32, i32
  }
  func.func @transform_7(%arg0: i32) -> (i32, i32, i32) {
    %c0_i32 = arith.constant 0 : i32
    %c0_i32_0 = arith.constant 0 : i32
    %c0_i32_1 = arith.constant 0 : i32
    %c0_i32_2 = arith.constant 0 : i32
    return %c0_i32, %c0_i32_0, %c0_i32_1 : i32, i32, i32
  }
  func.func @transform_8(%arg0: i32) -> i32 {
    %c0_i32 = arith.constant 0 : i32
    %c0_i32_0 = arith.constant 0 : i32
    return %c0_i32 : i32
  }
  func.func @transform_9(%arg0: i32) -> (i32, i32, i32) {
    %c0_i32 = arith.constant 0 : i32
    %c0_i32_0 = arith.constant 0 : i32
    %c0_i32_1 = arith.constant 0 : i32
    return %arg0, %c0_i32, %c0_i32_0 : i32, i32, i32
  }
}

</mosaic_0001>

<bundles_post_ra>
// kernel: tpu_custom_call.1
= control target key start
LH: loop header
LB: loop body
LE: loop exit
PB: predicated region body
PF: predicated region fallthrough
CT: control target
= control target key end

     0   :  { %vm74_vm0 = vcmask 64512   ;;  %vm220_vm1 = vcmask 195584   ;;  %v905_v7 = vmov 0   ;;  %s1228_s0 = inlined_call_operand.vmem [shape: f32[128,24], index: 0, kind: input, shape index: {}]   ;;  %s1229_s1 = inlined_call_operand.vmem [shape: f32[128,8], index: 1, kind: input, shape index: {}]   ;;  %s1230_s2 = inlined_call_operand.vmem [shape: f32[1,32,24], index: 2, kind: input, shape index: {}]   ;;  %s1231_s3 = inlined_call_operand.vmem [shape: f32[1,32,8], index: 3, kind: input, shape index: {}]   ;;  %s1232_s4 = inlined_call_operand.vmem [shape: f32[1,32,1], index: 4, kind: input, shape index: {}]   ;;  %s1233_s5 = inlined_call_operand.vmem [shape: f32[1,32,32], index: 5, kind: input, shape index: {}]   ;;  %s1234_s6 = inlined_call_operand.vmem [shape: f32[1,32,1], index: 6, kind: input, shape index: {}]   ;;  %s1235_s7 = inlined_call_operand.vmem [shape: f32[1,32,1], index: 7, kind: input, shape index: {}]   ;;  %s1236_s8 = inlined_call_operand.<no memory space> [shape: f32[1], index: 8, kind: input, shape index: {}]   ;;  %s1237_s9 = inlined_call_operand.hbm [shape: f32[1,1,128], index: 9, kind: output, shape index: {}]  }
   0x1   :  { %v50_v0 = vld [vmem:[%s1229_s1] sm:$0xff]  ;;  %v51_v1 = vld [vmem:[%s1229_s1 + $0x8] sm:$0xff]  ;;  %vm968_vm2 = vmpackc.low %vm74_vm0, %vm74_vm0  ;;  %879 = vset.pattern.permute.xlu0 %v905_v7  ;;  %880 = vset.pattern.permute.xlu1 %v905_v7 }
   0x2   :  { %v34_v2 = vld [vmem:[%s1228_s0] sm:$0xff]  ;;  %v765_v3 = vpack.c.bf16 %v51_v1, %v50_v0  ;;  %v35_v5 = vld [vmem:[%s1228_s0 + $0x8] sm:$0xff]  ;;  %v52_v6 = vld [vmem:[%s1229_s1 + $0x10] sm:$0xff] }
   0x3   :  { %v813_v8 = vpack.c.bf16 %v35_v5, %v34_v2  ;;  %vm980_vm3 = vmpackc.low %vm220_vm1, %vm220_vm1  ;;  %v53_v10 = vld [vmem:[%s1229_s1 + $0x18] sm:$0xff]  ;;  %v36_v11 = vld [vmem:[%s1228_s0 + $0x10] sm:$0xff] }
   0x4   :  { %767 = vmatprep.subr.msk.bf16.mxu1 %vm968_vm2, %v765_v3  ;;  %v771_v12 = vpack.c.bf16 %v53_v10, %v52_v6  ;;  %v37_v13 = vld [vmem:[%s1228_s0 + $0x18] sm:$0xff]  ;;  %v54_v15 = vld [vmem:[%s1229_s1 + $0x20] sm:$0xff]  ;;  %v55_v16 = vld [vmem:[%s1229_s1 + $0x28] sm:$0xff] }
   0x5   :  { %815 = vmatprep.subr.msk.bf16.mxu0 %vm980_vm3, %v813_v8  ;;  %770 = vmatpush3.bf16.xpose.msk.msra.mxu1 %vm968_vm2, %v765_v3  ;;  %v819_v14 = vpack.c.bf16 %v37_v13, %v36_v11  ;;  %v38_v17 = vld [vmem:[%s1228_s0 + $0x20] sm:$0xff]  ;;  %v39_v18 = vld [vmem:[%s1228_s0 + $0x28] sm:$0xff]  ;;  %v777_v19 = vpack.c.bf16 %v55_v16, %v54_v15  ;;  %v56_v23 = vld [vmem:[%s1229_s1 + $0x30] sm:$0xff] }
   0x6   :  { %818 = vmatpush3.bf16.xpose.msk.msra.mxu0 %vm980_vm3, %v813_v8  ;;  %773 = vmatprep.subr.msk.bf16.mxu1 %vm968_vm2, %v771_v12  ;;  %v825_v20 = vpack.c.bf16 %v39_v18, %v38_v17  ;;  %v70_v21 = vld [vmem:[%s1231_s3] sm:$0xff]  ;;  %v57_v24 = vld [vmem:[%s1229_s1 + $0x38] sm:$0xff]  ;;  %v368_v26 = vld [vmem:[%s1232_s4 + $0x10] sm:$0xff] }
   0x7   :  { %821 = vmatprep.subr.msk.bf16.mxu0 %vm980_vm3, %v819_v14  ;;  %v66_v22 = vld [vmem:[%s1230_s2] sm:$0xff]  ;;  %707 = vmatprep.mubr.msk.f32.mxu1 %vm74_vm0, %v70_v21  ;;  %v40_v27 = vld [vmem:[%s1228_s0 + $0x30] sm:$0xff]  ;;  %v41_v28 = vld [vmem:[%s1228_s0 + $0x38] sm:$0xff]  ;;  %v783_v31 = vpack.c.bf16 %v57_v24, %v56_v23 }
   0x8   :  { %745 = vmatprep.mubr.msk.f32.mxu0 %vm220_vm1, %v66_v22  ;;  %v366_v25 = vld [vmem:[%s1232_s4] sm:$0xff]  ;;  %382 = vperm.xlu1 %880, %v368_v26   ;;  %v367_v29 = vld [vmem:[%s1232_s4 + $0x8] sm:$0xff]  ;;  %v369_v30 = vld [vmem:[%s1232_s4 + $0x18] sm:$0xff]  ;;  %v831_v32 = vpack.c.bf16 %v41_v28, %v40_v27 }
   0x9   :  { %372 = vperm.xlu0 %879, %v366_v25  }
   0xd   :  { %776 = vmatpush3.bf16.xpose.msk.msra.mxu1 %vm968_vm2, %v771_v12 }
   0xe   :  { %824 = vmatpush3.bf16.xpose.msk.msra.mxu0 %vm980_vm3, %v819_v14  ;;  %779 = vmatprep.subr.msk.bf16.mxu1 %vm968_vm2, %v777_v19 }
   0xf   :  { %827 = vmatprep.subr.msk.bf16.mxu0 %vm980_vm3, %v825_v20 }
  0x10   :  { %15 = vsyncpa [#allocation4], 0  ;;  %377 = vperm.xlu0 %879, %v367_v29   ;;  %387 = vperm.xlu1 %880, %v369_v30   ;;  %v402_v33 = vld [vmem:[%s1234_s6] sm:$0xff]  ;;  %v403_v34 = vld [vmem:[%s1234_s6 + $0x8] sm:$0xff]  ;;  %vm426_vm4 = vcmask 261120   ;;  %s906_s27 = smov [#allocation3]  }
  0x11   :  { %v58_v35 = vld [vmem:[%s1229_s1 + $0x40] sm:$0xff]  ;;  %v59_v36 = vld [vmem:[%s1229_s1 + $0x48] sm:$0xff]  ;;  %v404_v39 = vld [vmem:[%s1234_s6 + $0x10] sm:$0xff]  ;;  %s575_s28 = sshll.u32 %s906_s27, 4  ;;  %s576_s28 = int_to_ptr.vmem [resolvable:$true] %s575_s28 }
  0x12   :  { %v42_v37 = vld [vmem:[%s1228_s0 + $0x40] sm:$0xff]  ;;  %v43_v38 = vld [vmem:[%s1228_s0 + $0x48] sm:$0xff]  ;;  %v405_v40 = vld [vmem:[%s1234_s6 + $0x18] sm:$0xff]  ;;  %v789_v41 = vpack.c.bf16 %v59_v36, %v58_v35  ;;  %s881_s29 = scalar_lea.vmem %s576_s28, 16  ;;  %s885_s6 = scalar_lea.vmem %s576_s28, 32 }
  0x13   :  { %v837_v42 = vpack.c.bf16 %v43_v38, %v42_v37  ;;  %v528_v43 = vld [vmem:[%s1235_s7] sm:$0xff]  ;;  %v529_v44 = vld [vmem:[%s1235_s7 + $0x8] sm:$0xff]  ;;  %v60_v45 = vld [vmem:[%s1229_s1 + $0x50] sm:$0xff]  ;;  %p882_p0 = scmp.ne.s32.totalorder %s576_s28, %s881_s29  ;;  %p886_p1 = scmp.lt.s32.totalorder %s576_s28, %s576_s28 }
  0x14   :  { %408 = vperm.xlu0 %879, %v402_v33   ;;  %413 = vperm.xlu1 %880, %v403_v34   ;;  %v61_v46 = vld [vmem:[%s1229_s1 + $0x58] sm:$0xff]  ;;  %v44_v47 = vld [vmem:[%s1228_s0 + $0x50] sm:$0xff]  ;;  %v62_v53 = vld [vmem:[%s1229_s1 + $0x60] sm:$0xff]  ;;  %p887_p2 = scmp.lt.s32.totalorder %s885_s6, %s881_s29 }
  0x15   :  { %782 = vmatpush3.bf16.xpose.msk.msra.mxu1 %vm968_vm2, %v777_v19  ;;  %v45_v48 = vld [vmem:[%s1228_s0 + $0x58] sm:$0xff]  ;;  %v530_v49 = vld [vmem:[%s1235_s7 + $0x10] sm:$0xff]  ;;  %v795_v51 = vpack.c.bf16 %v61_v46, %v60_v45  ;;  %v63_v54 = vld [vmem:[%s1229_s1 + $0x68] sm:$0xff] }
  0x16   :  { %830 = vmatpush3.bf16.xpose.msk.msra.mxu0 %vm980_vm3, %v825_v20  ;;  %785 = vmatprep.subr.msk.bf16.mxu1 %vm968_vm2, %v783_v31  ;;  %v531_v50 = vld [vmem:[%s1235_s7 + $0x18] sm:$0xff]  ;;  %v843_v52 = vpack.c.bf16 %v45_v48, %v44_v47  ;;  %v46_v55 = vld [vmem:[%s1228_s0 + $0x60] sm:$0xff]  ;;  %v47_v56 = vld [vmem:[%s1228_s0 + $0x68] sm:$0xff]  ;;  %v801_v57 = vpack.c.bf16 %v63_v54, %v62_v53  ;;  %p888_p3 = por %p887_p2, %p886_p1 }
  0x17   :  { %833 = vmatprep.subr.msk.bf16.mxu0 %vm980_vm3, %v831_v32  ;;  %v849_v58 = vpack.c.bf16 %v47_v56, %v46_v55  ;;  %v64_v59 = vld [vmem:[%s1229_s1 + $0x70] sm:$0xff]  ;;  %v65_v60 = vld [vmem:[%s1229_s1 + $0x78] sm:$0xff]  ;;  %v71_v1 = vld [vmem:[%s1231_s3 + $0x8] sm:$0xff] }
  0x18   :  { %418 = vperm.xlu0 %879, %v404_v39   ;;  %423 = vperm.xlu1 %880, %v405_v40   ;;  %v48_v61 = vld [vmem:[%s1228_s0 + $0x70] sm:$0xff]  ;;  %v49_v62 = vld [vmem:[%s1228_s0 + $0x78] sm:$0xff]  ;;  %v807_v63 = vpack.c.bf16 %v65_v60, %v64_v59  ;;  %v67_v2 = vld [vmem:[%s1230_s2 + $0x8] sm:$0xff]  ;;  %p889_p4 = pnand %p888_p3, %p882_p0 }
  0x19   :  { %v855_v0 = vpack.c.bf16 %v49_v62, %v48_v61  ;;  %v72_v3 = vld [vmem:[%s1231_s3 + $0x10] sm:$0xff]  ;;  %v73_v5 = vld [vmem:[%s1231_s3 + $0x18] sm:$0xff]  ;;  %v398_v7 = vld [vmem:[%s1233_s5] sm:$0xff] }
  0x1a   :  { %v68_v4 = vld [vmem:[%s1230_s2 + $0x10] sm:$0xff]  ;;  %v69_v6 = vld [vmem:[%s1230_s2 + $0x18] sm:$0xff]  ;;  %v399_v35 = vld [vmem:[%s1233_s5 + $0x8] sm:$0xff] }
  0x1b   :  { %v400_v8 = vld [vmem:[%s1233_s5 + $0x10] sm:$0xff]  ;;  %v401_v36 = vld [vmem:[%s1233_s5 + $0x18] sm:$0xff] }
  0x1c   :  { %534 = vperm.xlu0 %879, %v528_v43   ;;  %539 = vperm.xlu1 %880, %v529_v44  }
  0x1d   :  { %788 = vmatpush3.bf16.xpose.msk.msra.mxu1 %vm968_vm2, %v783_v31 }
  0x1e   :  { %836 = vmatpush3.bf16.xpose.msk.msra.mxu0 %vm980_vm3, %v831_v32  ;;  %791 = vmatprep.subr.msk.bf16.mxu1 %vm968_vm2, %v789_v41 }
  0x1f   :  { %839 = vmatprep.subr.msk.bf16.mxu0 %vm980_vm3, %v837_v42 }
  0x20   :  { %544 = vperm.xlu0 %879, %v530_v49   ;;  %549 = vperm.xlu1 %880, %v531_v50  }
  0x25   :  { %794 = vmatpush3.bf16.xpose.msk.msra.mxu1 %vm968_vm2, %v789_v41 }
  0x26   :  { %842 = vmatpush3.bf16.xpose.msk.msra.mxu0 %vm980_vm3, %v837_v42  ;;  %797 = vmatprep.subr.msk.bf16.mxu1 %vm968_vm2, %v795_v51 }
  0x27   :  { %845 = vmatprep.subr.msk.bf16.mxu0 %vm980_vm3, %v843_v52 }
  0x2d   :  { %800 = vmatpush3.bf16.xpose.msk.msra.mxu1 %vm968_vm2, %v795_v51 }
  0x2e   :  { %848 = vmatpush3.bf16.xpose.msk.msra.mxu0 %vm980_vm3, %v843_v52  ;;  %803 = vmatprep.subr.msk.bf16.mxu1 %vm968_vm2, %v801_v57 }
  0x2f   :  { %851 = vmatprep.subr.msk.bf16.mxu0 %vm980_vm3, %v849_v58 }
  0x35   :  { %806 = vmatpush3.bf16.xpose.msk.msra.mxu1 %vm968_vm2, %v801_v57 }
  0x36   :  { %854 = vmatpush3.bf16.xpose.msk.msra.mxu0 %vm980_vm3, %v849_v58  ;;  %809 = vmatprep.subr.msk.bf16.mxu1 %vm968_vm2, %v807_v63 }
  0x37   :  { %857 = vmatprep.subr.msk.bf16.mxu0 %vm980_vm3, %v855_v0 }
  0x3d   :  { %812 = vmatpush3.bf16.xpose.msk.msra.mxu1 %vm968_vm2, %v807_v63 }
  0x3e   :  { %860 = vmatpush3.bf16.xpose.msk.msra.mxu0 %vm980_vm3, %v855_v0 }
  0x44   :  { %708 = vmatmul.mubr.msk.f32.vlgmr.msra.gmra.mrb[0].mxu1 %vm74_vm0, %v71_v1 }
  0x45   :  { %746 = vmatmul.mubr.msk.f32.vlgmr.msra.gmra.mrb[0].mxu0 %vm220_vm1, %v67_v2  ;;  %710 = vmatprep.mubr.msk.f32.mxu1 %vm74_vm0, %v72_v3 }
  0x46   :  { %748 = vmatprep.mubr.msk.f32.mxu0 %vm220_vm1, %v68_v4 }
  0x48   :  { %711 = vmatmul.mubr.msk.f32.gmra.mrb[2].mxu1 %vm74_vm0, %v73_v5  ;;  %v566_v5 = vstv %s1236_s8 }
  0x49   :  { %749 = vmatmul.mubr.msk.f32.gmra.mrb[2].mxu0 %vm220_vm1, %v69_v6  ;;  %762 = vmatprep.mubr.msk.f32.mxu1 %vm426_vm4, %v400_v8 }
  0x4a   :  { %759 = vmatprep.mubr.msk.f32.mxu0 %vm426_vm4, %v398_v7 }
  0x87   :  { %v383_v10 = vpop.permute.xlu1 %382 }
  0x88   :  { %v373_v9 = vpop.permute.xlu0 %372 }
  0x8f   :  { %v378_v16 = vpop.permute.xlu0 %377  ;;  %v388_v26 = vpop.permute.xlu1 %387 }
  0x93   :  { %v409_v37 = vpop.permute.xlu0 %408  ;;  %v414_v38 = vpop.permute.xlu1 %413 }
  0x97   :  { %v419_v39 = vpop.permute.xlu0 %418  ;;  %v424_v40 = vpop.permute.xlu1 %423 }
  0x9b   :  { %v535_v41 = vpop.permute.xlu0 %534  ;;  %v540_v50 = vpop.permute.xlu1 %539 }
  0x9f   :  { %v545_v57 = vpop.permute.xlu0 %544  ;;  %v550_v60 = vpop.permute.xlu1 %549 }
 0x117   :  { %v709_v11 = vpop.f32.mrb[0].mxu1 }
 0x118   :  { %v747_v12 = vpop.f32.mrb[0].mxu0  ;;  %v201_v13 = vpop.f32.mrb[1].mxu1 }
 0x119   :  { %v353_v14 = vadd.f32 %v747_v12, %v709_v11  ;;  %v347_v15 = vpop.f32.mrb[1].mxu0 }
 0x11a   :  { %v348_v17 = vadd.f32 %v347_v15, %v201_v13 }
 0x11b   :  { %v391_v18 = vadd.f32 %v378_v16, %v353_v14  ;;  %v712_v19 = vpop.f32.mrb[2].mxu1 }
 0x11c   :  { %v390_v20 = vadd.f32 %v373_v9, %v348_v17  ;;  %v750_v21 = vpop.f32.mrb[2].mxu0  ;;  %v211_v22 = vpop.f32.mrb[3].mxu1 }
 0x11d   :  { %v395_v23 = vmax.f32 %v391_v18, 0.0  ;;  %v363_v24 = vadd.f32 %v750_v21, %v712_v19  ;;  %v357_v25 = vpop.f32.mrb[3].mxu0 }
 0x11e   :  { %v394_v27 = vmax.f32 %v390_v20, 0.0  ;;  %v358_v28 = vadd.f32 %v357_v25, %v211_v22 }
 0x11f   :  { %v393_v29 = vadd.f32 %v388_v26, %v363_v24 }
 0x120   :  { %v861_v30 = vpack.c.bf16 %v395_v23, %v394_v27  ;;  %v392_v31 = vadd.f32 %v383_v10, %v358_v28 }
 0x121   :  { %v397_v32 = vmax.f32 %v393_v29, 0.0 }
 0x122   :  { %v396_v33 = vmax.f32 %v392_v31, 0.0  ;;  %862 = vmatprep.subr.bf16.mxu0 %v861_v30  ;;  %869 = vmatprep.subr.bf16.mxu1 %v861_v30 }
 0x123   :  { %864 = vmatpush3.bf16.msra.mxu0 %v861_v30  ;;  %871 = vmatpush3.bf16.msra.mxu1 %v861_v30 }
 0x124   :  { %v865_v34 = vpack.c.bf16 %v397_v32, %v396_v33 }
 0x126   :  { %866 = vmatprep.subr.bf16.mxu0 %v865_v34  ;;  %870 = vmatprep.subr.bf16.mxu1 %v865_v34 }
 0x127   :  { %868 = vmatpush3.bf16.msra.mxu0 %v865_v34  ;;  %872 = vmatpush3.bf16.msra.mxu1 %v865_v34 }
 0x12a   :  { %760 = vmatmul.mubr.msk.f32.vlgmr.msra.gmra.mrb[4].mxu0 %vm426_vm4, %v399_v35  ;;  %763 = vmatmul.mubr.msk.f32.vlgmr.msra.gmra.mrb[4].mxu1 %vm426_vm4, %v401_v36 }
 0x1fd   :  { %v761_v42 = vpop.f32.mrb[4].mxu0  ;;  %v764_v43 = vpop.f32.mrb[4].mxu1 }
 0x1fe   :  { %v511_v44 = vadd.f32 %v761_v42, %v414_v38  ;;  %v505_v45 = vpop.f32.mrb[5].mxu0  ;;  %v515_v46 = vpop.f32.mrb[5].mxu1  ;;  %v521_v47 = vadd.f32 %v764_v43, %v424_v40 }
 0x1ff   :  { %v506_v48 = vadd.f32 %v505_v45, %v409_v37  ;;  %v516_v49 = vadd.f32 %v515_v46, %v419_v39 }
 0x200   :  { %v525_v51 = vmax.f32 %v511_v44, 0.0  ;;  %v527_v55 = vmax.f32 %v521_v47, 0.0 }
 0x201   :  { %v524_v52 = vmax.f32 %v506_v48, 0.0  ;;  %v526_v53 = vmax.f32 %v516_v49, 0.0 }
 0x202   :  { %v553_v54 = vmul.f32 %v540_v50, %v525_v51  ;;  %v555_v61 = vmul.f32 %v550_v60, %v527_v55 }
 0x203   :  { %v552_v56 = vmul.f32 %v535_v41, %v524_v52  ;;  %v554_v59 = vmul.f32 %v545_v57, %v526_v53 }
 0x205   :  { %v556_v58 = vadd.f32 %v553_v54, %v552_v56 }
 0x207   :  { %v557_v62 = vadd.f32 %v556_v58, %v554_v59 }
 0x209   :  { %v558_v63 = vadd.f32 %v557_v62, %v555_v61 }
 0x20b   :  { %v559_v0 = vrot.slane %v558_v63, 4 }
 0x20d   :  { %v560_v1 = vadd.f32 %v559_v0, %v558_v63 }
 0x20f   :  { %v561_v2 = vrot.slane %v560_v1, 2 }
 0x211   :  { %v562_v3 = vadd.f32 %v561_v2, %v560_v1 }
 0x213   :  { %v563_v4 = vrot.slane %v562_v3, 1 }
 0x215   :  { %v564_v6 = vadd.f32 %v563_v4, %v562_v3 }
 0x217   :  { %v567_v7 = vadd.f32 %v566_v5, %v564_v6 }
 0x219   :  { %568 = vst [vmem:[#allocation3] sm:$0x1] %v567_v7 }
 0x21a   :  { %892 = shalt.err (!%p889_p4)
}
 0x21b   :  { %s893_s11 = scalar_lea.hbm %s1237_s9, 16 }
 0x21c   :  { %p894_p5 = scmp.ne.s32.totalorder %s1237_s9, %s893_s11  ;;  %p897_p6 = scmp.lt.u32.totalorder %s893_s11, %s1237_s9 }
 0x21e   :  { %p899_p7 = pnand %p897_p6, %p894_p5 }
 0x220   :  { %902 = shalt.err (!%p899_p7)
}
 0x221   :  { %578 = dma.vmem_to_hbm [thread:$0]  %s576_s28, 16, %s1237_s9, [#allocation4]  }
 0x222   :  { %903 = dma.done.wait [#allocation4], 16  }
 0x223   :  { %904 = vsyncadd [#allocation4], 4294967280 }
 0x224   :  { %582 = vsyncpa [#allocation4], 1 }

</bundles_post_ra>
